<compile_context>
chip_gen: v7x
topology: tpu7x:2x2x1
jax: 0.10.0
libtpu: 0.0.40
codegen_flags: <defaults>
</compile_context>

<pallas_src>
import jax
import jax.numpy as jnp
from jax.experimental import pallas as pl
from jax.experimental.pallas import tpu as pltpu


# ----------------------------------------------------------------------------
# Fused kernel: both encoders + folded fusion head for one block of B samples.
# ----------------------------------------------------------------------------
def _fused_forward_kernel(xp_ref, xd_ref,
                          wp_ref, bp_ref, wd_ref, bd_ref,
                          at_ref, bt_ref, c_ref,
                          out_ref, p_scr, d_scr):
    """One grid step processes a block of B samples end-to-end.

    xp_ref, xd_ref : (B, C, TV)  f32   pose / dirvec inputs (TV lane-dense)
    wp_ref, wd_ref : (H, C)      bf16  encoder 1x1-conv weights
    bp_ref, bd_ref : (H, 1)      f32   encoder biases
    at_ref, bt_ref : (K, H)      bf16  folded head weights (A^T, B^T)
    c_ref          : (K, 1)      f32   folded head constant
    out_ref        : (K, B)      f32   transposed output block (batch on lanes)
    p_scr, d_scr   : (H, B)      f32   pooled-hidden scratch (batch on lanes)
    """
    B = xp_ref.shape[0]
    inv_tv = jnp.float32(1.0 / xp_ref.shape[2])

    def encode_one(x_ref, w_ref, b_ref, scr, b):
        x = x_ref[b].astype(jnp.bfloat16)                          # (C, TV)
        h = jnp.dot(w_ref[...], x,
                    preferred_element_type=jnp.float32)            # (H, TV)
        h = jnp.maximum(h + b_ref[...], 0.0)                       # ReLU, f32
        # global mean pool over (T, V) == lane reduction
        scr[:, pl.ds(b, 1)] = jnp.sum(h, axis=1, keepdims=True) * inv_tv

    for b in range(B):                      # B is a small static constant
        encode_one(xp_ref, wp_ref, bp_ref, p_scr, b)
        encode_one(xd_ref, wd_ref, bd_ref, d_scr, b)

    # Folded head, batched over all B samples:  out^T = A^T @ P + B^T @ D + c
    out_ref[...] = (
        jnp.dot(at_ref[...], p_scr[...].astype(jnp.bfloat16),
                preferred_element_type=jnp.float32)
        + jnp.dot(bt_ref[...], d_scr[...].astype(jnp.bfloat16),
                  preferred_element_type=jnp.float32)
        + c_ref[...])


# ----------------------------------------------------------------------------
# Wrapper: head folding (trace-time), layout prep, single pallas_call.
# ----------------------------------------------------------------------------
def multi_laterfusion_pd_forward(pose_nctv, dirvec_nctv, params):
    pose = pose_nctv.astype(jnp.float32)      # matches `pose.float()`
    dirvec = dirvec_nctv.astype(jnp.float32)
    N, Cp, T, V = pose.shape
    _, Cd, _, _ = dirvec.shape
    TV = T * V

    # Free reshape (no transpose -> no extra HBM pass): (N, C, T, V) -> (N, C, TV)
    xp = pose.reshape(N, Cp, TV)
    xd = dirvec.reshape(N, Cd, TV)

    # ---- fold the purely-linear head at trace time (tiny 32x32 XLA matmuls) --
    A = params["wp"] @ params["wf1"] @ params["wo"]                  # (H, K)
    Bm = params["wd"] @ params["wf2"] @ params["wo"]                 # (H, K)
    c = (params["bp"] @ params["wf1"] + params["bd"] @ params["wf2"]
         + params["bf"]) @ params["wo"] + params["bo"]               # (1, K)

    at = A.T.astype(jnp.bfloat16)                                    # (K, H)
    bt = Bm.T.astype(jnp.bfloat16)                                   # (K, H)
    c_col = c.T                                                      # (K, 1)

    wp_enc = params["w_pose_enc"].astype(jnp.bfloat16)               # (H, Cp)
    wd_enc = params["w_dir_enc"].astype(jnp.bfloat16)                # (H, Cd)
    bp_enc = params["b_pose_enc"]                                    # (H, 1) f32
    bd_enc = params["b_dir_enc"]                                     # (H, 1) f32

    H = wp_enc.shape[0]
    K = at.shape[0]

    # Batch blocking: small N -> one grid step; large N -> 128-sample blocks
    # (128 keeps the (K, blk) output block lane-aligned and the stores dense).
    blk = N if N <= 128 else 128
    n_blk = pl.cdiv(N, blk)
    Np = n_blk * blk
    if Np != N:
        pad = ((0, Np - N), (0, 0), (0, 0))
        xp = jnp.pad(xp, pad)
        xd = jnp.pad(xd, pad)

    out_t = pl.pallas_call(
        _fused_forward_kernel,
        out_shape=jax.ShapeDtypeStruct((K, Np), jnp.float32),
        grid=(n_blk,),
        in_specs=[
            pl.BlockSpec((blk, Cp, TV), lambda i: (i, 0, 0)),
            pl.BlockSpec((blk, Cd, TV), lambda i: (i, 0, 0)),
            pl.BlockSpec((H, Cp), lambda i: (0, 0)),   # weights: resident blocks
            pl.BlockSpec((H, 1), lambda i: (0, 0)),
            pl.BlockSpec((H, Cd), lambda i: (0, 0)),
            pl.BlockSpec((H, 1), lambda i: (0, 0)),
            pl.BlockSpec((K, H), lambda i: (0, 0)),
            pl.BlockSpec((K, H), lambda i: (0, 0)),
            pl.BlockSpec((K, 1), lambda i: (0, 0)),
        ],
        out_specs=pl.BlockSpec((K, blk), lambda i: (0, i)),
        scratch_shapes=[
            pltpu.VMEM((H, blk), jnp.float32),
            pltpu.VMEM((H, blk), jnp.float32),
        ],
        compiler_params=pltpu.CompilerParams(
            dimension_semantics=("parallel",)),        # megacore / v7x 2-TC split
    )(xp, xd, wp_enc, bp_enc, wd_enc, bd_enc, at, bt, c_col)

    # (K, N) -> (N, K): trivial wrapper transpose of a tiny result.
    return out_t[:, :N].T


# ----------------------------------------------------------------------------
# Pure-JAX f32 reference (un-folded head) for a sanity check.
# ----------------------------------------------------------------------------
def reference_forward(pose_nctv, dirvec_nctv, p):
    def enc(x, w, b):                       # w: (H, C), b: (H, 1)
        Nx, Cx, Tt, Vv = x.shape
        xr = x.astype(jnp.float32).reshape(Nx, Cx, Tt * Vv)
        h = jnp.maximum(jnp.einsum("hc,ncv->nhv", w, xr) + b[None], 0.0)
        return jnp.mean(h, axis=2)          # (N, H)

    ph = enc(pose_nctv, p["w_pose_enc"], p["b_pose_enc"])
    dh = enc(dirvec_nctv, p["w_dir_enc"], p["b_dir_enc"])
    pf = ph @ p["wp"] + p["bp"]
    df = dh @ p["wd"] + p["bd"]
    fused = (jnp.concatenate([pf, df], axis=-1)
             @ jnp.concatenate([p["wf1"], p["wf2"]], axis=0) + p["bf"])
    return fused @ p["wo"] + p["bo"]


if __name__ == "__main__":
    # Small shapes consistent with the module's forward; T*V = 128 (lane-dense).
    N, C_POSE, C_DIR, T, V = 2, 4, 4, 16, 8
    HIDDEN, FUSION_DIM, NUM_CLASS = 32, 32, 8

    key = jax.random.PRNGKey(0)
    ks = jax.random.split(key, 16)
    s = 0.1
    params = {
        "w_pose_enc": s * jax.random.normal(ks[0], (HIDDEN, C_POSE), jnp.float32),
        "b_pose_enc": s * jax.random.normal(ks[1], (HIDDEN, 1), jnp.float32),
        "w_dir_enc":  s * jax.random.normal(ks[2], (HIDDEN, C_DIR), jnp.float32),
        "b_dir_enc":  s * jax.random.normal(ks[3], (HIDDEN, 1), jnp.float32),
        "wp":  s * jax.random.normal(ks[4], (HIDDEN, FUSION_DIM), jnp.float32),
        "bp":  s * jax.random.normal(ks[5], (1, FUSION_DIM), jnp.float32),
        "wd":  s * jax.random.normal(ks[6], (HIDDEN, FUSION_DIM), jnp.float32),
        "bd":  s * jax.random.normal(ks[7], (1, FUSION_DIM), jnp.float32),
        "wf1": s * jax.random.normal(ks[8], (FUSION_DIM, FUSION_DIM), jnp.float32),
        "wf2": s * jax.random.normal(ks[9], (FUSION_DIM, FUSION_DIM), jnp.float32),
        "bf":  s * jax.random.normal(ks[10], (1, FUSION_DIM), jnp.float32),
        "wo":  s * jax.random.normal(ks[11], (FUSION_DIM, NUM_CLASS), jnp.float32),
        "bo":  s * jax.random.normal(ks[12], (1, NUM_CLASS), jnp.float32),
    }

    pose = jax.random.normal(ks[13], (N, C_POSE, T, V), jnp.float32)
    dirvec = jax.random.normal(ks[14], (N, C_DIR, T, V), jnp.float32)

    fwd = jax.jit(multi_laterfusion_pd_forward)
    out = jax.block_until_ready(fwd(pose, dirvec, params))

    ref = reference_forward(pose, dirvec, params)
    assert out.shape == (N, NUM_CLASS), out.shape
    # bf16 MXU operands (f32 accumulation) => relaxed from the f32 1e-5 tolerance.
    max_diff = float(jnp.max(jnp.abs(out - ref)))
    assert jnp.allclose(out, ref, atol=1e-2, rtol=1e-2), (
        f"mismatch vs reference: max abs diff {max_diff}")

    print("KERNEL_OK")
</pallas_src>

<mosaic_0001>
module attributes {stable_mosaic.version = 11 : i64} {
  func.func @_fused_forward_kernel(%arg0: i32, %arg1: memref<2x4x128xf32, #tpu.memory_space<vmem>>, %arg2: memref<2x4x128xf32, #tpu.memory_space<vmem>>, %arg3: memref<32x4xbf16, #tpu.memory_space<vmem>>, %arg4: memref<32x1xf32, #tpu.memory_space<vmem>>, %arg5: memref<32x4xbf16, #tpu.memory_space<vmem>>, %arg6: memref<32x1xf32, #tpu.memory_space<vmem>>, %arg7: memref<8x32xbf16, #tpu.memory_space<vmem>>, %arg8: memref<8x32xbf16, #tpu.memory_space<vmem>>, %arg9: memref<8x1xf32, #tpu.memory_space<vmem>>, %arg10: memref<8x2xf32, #tpu.memory_space<vmem>>, %arg11: memref<32x2xf32, #tpu.memory_space<vmem>>, %arg12: memref<32x2xf32, #tpu.memory_space<vmem>>) attributes {dimension_semantics = [#tpu.dimension_semantics<parallel>], iteration_bounds = array<i64: 1>, scalar_prefetch = 0 : i64, scratch_operands = 2 : i64, tpu.core_type = #tpu.core_type<tc>, window_params = [{transform_indices = @transform_0, window_bounds = array<i64: 2, 4, 128>}, {transform_indices = @transform_1, window_bounds = array<i64: 2, 4, 128>}, {pipeline_mode = #tpu.pipeline_mode<synchronous>, transform_indices = @transform_2, window_bounds = array<i64: 32, 4>}, {pipeline_mode = #tpu.pipeline_mode<synchronous>, transform_indices = @transform_3, window_bounds = array<i64: 32, 1>}, {pipeline_mode = #tpu.pipeline_mode<synchronous>, transform_indices = @transform_4, window_bounds = array<i64: 32, 4>}, {pipeline_mode = #tpu.pipeline_mode<synchronous>, transform_indices = @transform_5, window_bounds = array<i64: 32, 1>}, {pipeline_mode = #tpu.pipeline_mode<synchronous>, transform_indices = @transform_6, window_bounds = array<i64: 8, 32>}, {pipeline_mode = #tpu.pipeline_mode<synchronous>, transform_indices = @transform_7, window_bounds = array<i64: 8, 32>}, {pipeline_mode = #tpu.pipeline_mode<synchronous>, transform_indices = @transform_8, window_bounds = array<i64: 8, 1>}, {transform_indices = @transform_9, window_bounds = array<i64: 8, 2>}]} {
    %c0 = arith.constant 0 : index
    %c0_0 = arith.constant 0 : index
    %c0_1 = arith.constant 0 : index
    %0 = vector.load %arg1[%c0, %c0_0, %c0_1] : memref<2x4x128xf32, #tpu.memory_space<vmem>>, vector<1x4x128xf32>
    %1 = vector.shape_cast %0 : vector<1x4x128xf32> to vector<4x128xf32>
    %2 = arith.truncf %1 : vector<4x128xf32> to vector<4x128xbf16>
    %c0_2 = arith.constant 0 : index
    %c0_3 = arith.constant 0 : index
    %3 = vector.load %arg3[%c0_2, %c0_3] : memref<32x4xbf16, #tpu.memory_space<vmem>>, vector<32x4xbf16>
    %cst = arith.constant dense<0.000000e+00> : vector<32x128xf32>
    %4 = tpu.matmul %3, %2, %cst {dimension_numbers = #tpu.dot_dimension_numbers<[1], [0], [0], [1], [0, 0, 1, 1], [], []>} : vector<32x4xbf16>, vector<4x128xbf16>, vector<32x128xf32> -> vector<32x128xf32>
    %c0_4 = arith.constant 0 : index
    %c0_5 = arith.constant 0 : index
    %5 = vector.load %arg4[%c0_4, %c0_5] : memref<32x1xf32, #tpu.memory_space<vmem>>, vector<32x1xf32>
    %6 = vector.broadcast %5 : vector<32x1xf32> to vector<32x128xf32>
    %7 = arith.addf %4, %6 : vector<32x128xf32>
    %cst_6 = arith.constant 0.000000e+00 : f32
    %8 = vector.broadcast %cst_6 : f32 to vector<32x128xf32>
    %9 = arith.maximumf %7, %8 : vector<32x128xf32>
    %cst_7 = arith.constant dense<0.000000e+00> : vector<32xf32>
    %10 = vector.multi_reduction <add>, %9, %cst_7 [1] : vector<32x128xf32> to vector<32xf32>
    %11 = vector.shape_cast %10 : vector<32xf32> to vector<32x1xf32>
    %cst_8 = arith.constant 7.812500e-03 : f32
    %12 = vector.broadcast %cst_8 : f32 to vector<32x1xf32>
    %13 = arith.mulf %11, %12 : vector<32x1xf32>
    %c0_9 = arith.constant 0 : index
    %c0_10 = arith.constant 0 : index
    %14 = vector.load %arg11[%c0_9, %c0_10] : memref<32x2xf32, #tpu.memory_space<vmem>>, vector<32x1xf32>
    tpu.vector_store %arg11[%c0_9, %c0_10], %13 {strides = array<i32>} : memref<32x2xf32, #tpu.memory_space<vmem>>, vector<32x1xf32>,
    %c0_11 = arith.constant 0 : index
    %c0_12 = arith.constant 0 : index
    %c0_13 = arith.constant 0 : index
    %15 = vector.load %arg2[%c0_11, %c0_12, %c0_13] : memref<2x4x128xf32, #tpu.memory_space<vmem>>, vector<1x4x128xf32>
    %16 = vector.shape_cast %15 : vector<1x4x128xf32> to vector<4x128xf32>
    %17 = arith.truncf %16 : vector<4x128xf32> to vector<4x128xbf16>
    %c0_14 = arith.constant 0 : index
    %c0_15 = arith.constant 0 : index
    %18 = vector.load %arg5[%c0_14, %c0_15] : memref<32x4xbf16, #tpu.memory_space<vmem>>, vector<32x4xbf16>
    %cst_16 = arith.constant dense<0.000000e+00> : vector<32x128xf32>
    %19 = tpu.matmul %18, %17, %cst_16 {dimension_numbers = #tpu.dot_dimension_numbers<[1], [0], [0], [1], [0, 0, 1, 1], [], []>} : vector<32x4xbf16>, vector<4x128xbf16>, vector<32x128xf32> -> vector<32x128xf32>
    %c0_17 = arith.constant 0 : index
    %c0_18 = arith.constant 0 : index
    %20 = vector.load %arg6[%c0_17, %c0_18] : memref<32x1xf32, #tpu.memory_space<vmem>>, vector<32x1xf32>
    %21 = vector.broadcast %20 : vector<32x1xf32> to vector<32x128xf32>
    %22 = arith.addf %19, %21 : vector<32x128xf32>
    %cst_19 = arith.constant 0.000000e+00 : f32
    %23 = vector.broadcast %cst_19 : f32 to vector<32x128xf32>
    %24 = arith.maximumf %22, %23 : vector<32x128xf32>
    %cst_20 = arith.constant dense<0.000000e+00> : vector<32xf32>
    %25 = vector.multi_reduction <add>, %24, %cst_20 [1] : vector<32x128xf32> to vector<32xf32>
    %26 = vector.shape_cast %25 : vector<32xf32> to vector<32x1xf32>
    %cst_21 = arith.constant 7.812500e-03 : f32
    %27 = vector.broadcast %cst_21 : f32 to vector<32x1xf32>
    %28 = arith.mulf %26, %27 : vector<32x1xf32>
    %c0_22 = arith.constant 0 : index
    %c0_23 = arith.constant 0 : index
    %29 = vector.load %arg12[%c0_22, %c0_23] : memref<32x2xf32, #tpu.memory_space<vmem>>, vector<32x1xf32>
    tpu.vector_store %arg12[%c0_22, %c0_23], %28 {strides = array<i32>} : memref<32x2xf32, #tpu.memory_space<vmem>>, vector<32x1xf32>,
    %c1 = arith.constant 1 : index
    %c0_24 = arith.constant 0 : index
    %c0_25 = arith.constant 0 : index
    %30 = vector.load %arg1[%c1, %c0_24, %c0_25] : memref<2x4x128xf32, #tpu.memory_space<vmem>>, vector<1x4x128xf32>
    %31 = vector.shape_cast %30 : vector<1x4x128xf32> to vector<4x128xf32>
    %32 = arith.truncf %31 : vector<4x128xf32> to vector<4x128xbf16>
    %c0_26 = arith.constant 0 : index
    %c0_27 = arith.constant 0 : index
    %33 = vector.load %arg3[%c0_26, %c0_27] : memref<32x4xbf16, #tpu.memory_space<vmem>>, vector<32x4xbf16>
    %cst_28 = arith.constant dense<0.000000e+00> : vector<32x128xf32>
    %34 = tpu.matmul %33, %32, %cst_28 {dimension_numbers = #tpu.dot_dimension_numbers<[1], [0], [0], [1], [0, 0, 1, 1], [], []>} : vector<32x4xbf16>, vector<4x128xbf16>, vector<32x128xf32> -> vector<32x128xf32>
    %c0_29 = arith.constant 0 : index
    %c0_30 = arith.constant 0 : index
    %35 = vector.load %arg4[%c0_29, %c0_30] : memref<32x1xf32, #tpu.memory_space<vmem>>, vector<32x1xf32>
    %36 = vector.broadcast %35 : vector<32x1xf32> to vector<32x128xf32>
    %37 = arith.addf %34, %36 : vector<32x128xf32>
    %cst_31 = arith.constant 0.000000e+00 : f32
    %38 = vector.broadcast %cst_31 : f32 to vector<32x128xf32>
    %39 = arith.maximumf %37, %38 : vector<32x128xf32>
    %cst_32 = arith.constant dense<0.000000e+00> : vector<32xf32>
    %40 = vector.multi_reduction <add>, %39, %cst_32 [1] : vector<32x128xf32> to vector<32xf32>
    %41 = vector.shape_cast %40 : vector<32xf32> to vector<32x1xf32>
    %cst_33 = arith.constant 7.812500e-03 : f32
    %42 = vector.broadcast %cst_33 : f32 to vector<32x1xf32>
    %43 = arith.mulf %41, %42 : vector<32x1xf32>
    %c0_34 = arith.constant 0 : index
    %c1_35 = arith.constant 1 : index
    %44 = vector.load %arg11[%c0_34, %c1_35] : memref<32x2xf32, #tpu.memory_space<vmem>>, vector<32x1xf32>
    tpu.vector_store %arg11[%c0_34, %c1_35], %43 {strides = array<i32>} : memref<32x2xf32, #tpu.memory_space<vmem>>, vector<32x1xf32>,
    %c1_36 = arith.constant 1 : index
    %c0_37 = arith.constant 0 : index
    %c0_38 = arith.constant 0 : index
    %45 = vector.load %arg2[%c1_36, %c0_37, %c0_38] : memref<2x4x128xf32, #tpu.memory_space<vmem>>, vector<1x4x128xf32>
    %46 = vector.shape_cast %45 : vector<1x4x128xf32> to vector<4x128xf32>
    %47 = arith.truncf %46 : vector<4x128xf32> to vector<4x128xbf16>
    %c0_39 = arith.constant 0 : index
    %c0_40 = arith.constant 0 : index
    %48 = vector.load %arg5[%c0_39, %c0_40] : memref<32x4xbf16, #tpu.memory_space<vmem>>, vector<32x4xbf16>
    %cst_41 = arith.constant dense<0.000000e+00> : vector<32x128xf32>
    %49 = tpu.matmul %48, %47, %cst_41 {dimension_numbers = #tpu.dot_dimension_numbers<[1], [0], [0], [1], [0, 0, 1, 1], [], []>} : vector<32x4xbf16>, vector<4x128xbf16>, vector<32x128xf32> -> vector<32x128xf32>
    %c0_42 = arith.constant 0 : index
    %c0_43 = arith.constant 0 : index
    %50 = vector.load %arg6[%c0_42, %c0_43] : memref<32x1xf32, #tpu.memory_space<vmem>>, vector<32x1xf32>
    %51 = vector.broadcast %50 : vector<32x1xf32> to vector<32x128xf32>
    %52 = arith.addf %49, %51 : vector<32x128xf32>
    %cst_44 = arith.constant 0.000000e+00 : f32
    %53 = vector.broadcast %cst_44 : f32 to vector<32x128xf32>
    %54 = arith.maximumf %52, %53 : vector<32x128xf32>
    %cst_45 = arith.constant dense<0.000000e+00> : vector<32xf32>
    %55 = vector.multi_reduction <add>, %54, %cst_45 [1] : vector<32x128xf32> to vector<32xf32>
    %56 = vector.shape_cast %55 : vector<32xf32> to vector<32x1xf32>
    %cst_46 = arith.constant 7.812500e-03 : f32
    %57 = vector.broadcast %cst_46 : f32 to vector<32x1xf32>
    %58 = arith.mulf %56, %57 : vector<32x1xf32>
    %c0_47 = arith.constant 0 : index
    %c1_48 = arith.constant 1 : index
    %59 = vector.load %arg12[%c0_47, %c1_48] : memref<32x2xf32, #tpu.memory_space<vmem>>, vector<32x1xf32>
    tpu.vector_store %arg12[%c0_47, %c1_48], %58 {strides = array<i32>} : memref<32x2xf32, #tpu.memory_space<vmem>>, vector<32x1xf32>,
    %c0_49 = arith.constant 0 : index
    %c0_50 = arith.constant 0 : index
    %60 = vector.load %arg7[%c0_49, %c0_50] : memref<8x32xbf16, #tpu.memory_space<vmem>>, vector<8x32xbf16>
    %c0_51 = arith.constant 0 : index
    %c0_52 = arith.constant 0 : index
    %61 = vector.load %arg11[%c0_51, %c0_52] : memref<32x2xf32, #tpu.memory_space<vmem>>, vector<32x2xf32>
    %62 = arith.truncf %61 : vector<32x2xf32> to vector<32x2xbf16>
    %cst_53 = arith.constant dense<0.000000e+00> : vector<8x2xf32>
    %63 = tpu.matmul %60, %62, %cst_53 {dimension_numbers = #tpu.dot_dimension_numbers<[1], [0], [0], [1], [0, 0, 1, 1], [], []>} : vector<8x32xbf16>, vector<32x2xbf16>, vector<8x2xf32> -> vector<8x2xf32>
    %c0_54 = arith.constant 0 : index
    %c0_55 = arith.constant 0 : index
    %64 = vector.load %arg8[%c0_54, %c0_55] : memref<8x32xbf16, #tpu.memory_space<vmem>>, vector<8x32xbf16>
    %c0_56 = arith.constant 0 : index
    %c0_57 = arith.constant 0 : index
    %65 = vector.load %arg12[%c0_56, %c0_57] : memref<32x2xf32, #tpu.memory_space<vmem>>, vector<32x2xf32>
    %66 = arith.truncf %65 : vector<32x2xf32> to vector<32x2xbf16>
    %cst_58 = arith.constant dense<0.000000e+00> : vector<8x2xf32>
    %67 = tpu.matmul %64, %66, %cst_58 {dimension_numbers = #tpu.dot_dimension_numbers<[1], [0], [0], [1], [0, 0, 1, 1], [], []>} : vector<8x32xbf16>, vector<32x2xbf16>, vector<8x2xf32> -> vector<8x2xf32>
    %68 = arith.addf %63, %67 : vector<8x2xf32>
    %c0_59 = arith.constant 0 : index
    %c0_60 = arith.constant 0 : index
    %69 = vector.load %arg9[%c0_59, %c0_60] : memref<8x1xf32, #tpu.memory_space<vmem>>, vector<8x1xf32>
    %70 = vector.broadcast %69 : vector<8x1xf32> to vector<8x2xf32>
    %71 = arith.addf %68, %70 : vector<8x2xf32>
    %c0_61 = arith.constant 0 : index
    %c0_62 = arith.constant 0 : index
    %72 = vector.load %arg10[%c0_61, %c0_62] : memref<8x2xf32, #tpu.memory_space<vmem>>, vector<8x2xf32>
    tpu.vector_store %arg10[%c0_61, %c0_62], %71 {strides = array<i32>} : memref<8x2xf32, #tpu.memory_space<vmem>>, vector<8x2xf32>,
    return
  }
  func.func @transform_0(%arg0: i32) -> (i32, i32, i32) {
    %c0_i32 = arith.constant 0 : i32
    %c0_i32_0 = arith.constant 0 : i32
    %c0_i32_1 = arith.constant 0 : i32
    return %arg0, %c0_i32, %c0_i32_0 : i32, i32, i32
  }
  func.func @transform_1(%arg0: i32) -> (i32, i32, i32) {
    %c0_i32 = arith.constant 0 : i32
    %c0_i32_0 = arith.constant 0 : i32
    %c0_i32_1 = arith.constant 0 : i32
    return %arg0, %c0_i32, %c0_i32_0 : i32, i32, i32
  }
  func.func @transform_2(%arg0: i32) -> (i32, i32) {
    %c0_i32 = arith.constant 0 : i32
    %c0_i32_0 = arith.constant 0 : i32
    %c0_i32_1 = arith.constant 0 : i32
    return %c0_i32, %c0_i32_0 : i32, i32
  }
  func.func @transform_3(%arg0: i32) -> (i32, i32) {
    %c0_i32 = arith.constant 0 : i32
    %c0_i32_0 = arith.constant 0 : i32
    %c0_i32_1 = arith.constant 0 : i32
    return %c0_i32, %c0_i32_0 : i32, i32
  }
  func.func @transform_4(%arg0: i32) -> (i32, i32) {
    %c0_i32 = arith.constant 0 : i32
    %c0_i32_0 = arith.constant 0 : i32
    %c0_i32_1 = arith.constant 0 : i32
    return %c0_i32, %c0_i32_0 : i32, i32
  }
  func.func @transform_5(%arg0: i32) -> (i32, i32) {
    %c0_i32 = arith.constant 0 : i32
    %c0_i32_0 = arith.constant 0 : i32
    %c0_i32_1 = arith.constant 0 : i32
    return %c0_i32, %c0_i32_0 : i32, i32
  }
  func.func @transform_6(%arg0: i32) -> (i32, i32) {
    %c0_i32 = arith.constant 0 : i32
    %c0_i32_0 = arith.constant 0 : i32
    %c0_i32_1 = arith.constant 0 : i32
    return %c0_i32, %c0_i32_0 : i32, i32
  }
  func.func @transform_7(%arg0: i32) -> (i32, i32) {
    %c0_i32 = arith.constant 0 : i32
    %c0_i32_0 = arith.constant 0 : i32
    %c0_i32_1 = arith.constant 0 : i32
    return %c0_i32, %c0_i32_0 : i32, i32
  }
  func.func @transform_8(%arg0: i32) -> (i32, i32) {
    %c0_i32 = arith.constant 0 : i32
    %c0_i32_0 = arith.constant 0 : i32
    %c0_i32_1 = arith.constant 0 : i32
    return %c0_i32, %c0_i32_0 : i32, i32
  }
  func.func @transform_9(%arg0: i32) -> (i32, i32) {
    %c0_i32 = arith.constant 0 : i32
    %c0_i32_0 = arith.constant 0 : i32
    return %c0_i32, %arg0 : i32, i32
  }
}

</mosaic_0001>

<bundles_post_ra>
// kernel: multi_laterfusion_pd_forward.1
= control target key start
LH: loop header
LB: loop body
LE: loop exit
PB: predicated region body
PF: predicated region fallthrough
CT: control target
= control target key end

     0   :  { %vm80_vm0 = vcmask 1041408   ;;  %v720_v3 = vmov 0   ;;  %vm73_vm1 = vcmask 31744   ;;  %vm722_vm2 = vmmov 0   ;;  %s886_s0 = inlined_call_operand.vmem [shape: f32[2,4,128], index: 0, kind: input, shape index: {}]   ;;  %s887_s1 = inlined_call_operand.vmem [shape: f32[2,4,128], index: 1, kind: input, shape index: {}]   ;;  %s888_s2 = inlined_call_operand.vmem [shape: bf16[32,4], index: 2, kind: input, shape index: {}]   ;;  %s889_s4 = inlined_call_operand.vmem [shape: bf16[32,4], index: 4, kind: input, shape index: {}]   ;;  %s890_s5 = inlined_call_operand.vmem [shape: f32[32,1], index: 5, kind: input, shape index: {}]   ;;  %s891_s3 = inlined_call_operand.vmem [shape: f32[32,1], index: 3, kind: input, shape index: {}]   ;;  %s892_s8 = inlined_call_operand.vmem [shape: f32[8,1], index: 8, kind: input, shape index: {}]   ;;  %s893_s6 = inlined_call_operand.vmem [shape: bf16[8,32], index: 6, kind: input, shape index: {}]   ;;  %s894_s7 = inlined_call_operand.vmem [shape: bf16[8,32], index: 7, kind: input, shape index: {}]   ;;  %s895_s9 = inlined_call_operand.vmem [shape: f32[8,2], index: 9, kind: output, shape index: {}]  }
   0x1   :  { %v33_v0 = vld [vmem:[%s886_s0] sm:$0xf]  ;;  %v633_v1 = vld [vmem:[%s886_s0 + $0x4] sm:$0xf]  ;;  %711 = vset.pattern.permute.xlu1 %v720_v3  ;;  %710 = vset.pattern.permute.xlu0 %v720_v3  ;;  %v714_v13 = vld [vmem:[%s888_s2 + $0x8] sm:$0xff]   ;;  %vm149_vm3 = vcmask 7168  }
   0x2   :  { %v154_v2 = vld [vmem:[%s887_s1] sm:$0xf]  ;;  %v34_v4 = vpack.c.bf16 %v33_v0, %v33_v0  ;;  %v274_v5 = vpack.c.bf16 %v633_v1, %v633_v1  ;;  %v638_v7 = vld [vmem:[%s887_s1 + $0x4] sm:$0xf]  ;;  %v715_v14 = vld [vmem:[%s889_s4 + $0x8] sm:$0xff]   ;;  %vm387_vm4 = vcmask 15368  }
   0x3   :  { %v155_v6 = vpack.c.bf16 %v154_v2, %v154_v2  ;;  %v394_v8 = vpack.c.bf16 %v638_v7, %v638_v7  ;;  %v712_v9 = vld [vmem:[%s888_s2] sm:$0xff]   ;;  %v718_v21 = vld [vmem:[%s888_s2 + $0x8] sm:$0xff]   ;;  %v42_v25 = vld [vmem:[%s891_s3 + $0x18] sm:$0xff]  ;;  %vm525_vm5 = vcmask 261120   ;;  %vm619_vm6 = vcmask 15360  }
   0x4   :  { %703 = vmatprep.subr.msk.bf16.mxu0 %vm80_vm0, %v34_v4  ;;  %v82_v10 = vsel %vm80_vm0, %v34_v4, 0  ;;  %v713_v12 = vld [vmem:[%s889_s4] sm:$0xff]   ;;  %665 = vmatprep.mubr.msk.bf16.mxu0 %vm73_vm1, %v712_v9  ;;  %v320_v15 = vsel %vm80_vm0, %v274_v5, 0  ;;  %v719_v22 = vld [vmem:[%s889_s4 + $0x8] sm:$0xff]   ;;  %v41_v26 = vld [vmem:[%s891_s3 + $0x10] sm:$0xff] }
   0x5   :  { %704 = vmatprep.subr.msk.bf16.mxu1 %vm80_vm0, %v155_v6  ;;  %v201_v11 = vsel %vm80_vm0, %v155_v6, 0  ;;  %664 = vmatpush3.bf16.msra.mxu0 %v82_v10  ;;  %v440_v16 = vsel %vm80_vm0, %v394_v8, 0  ;;  %v716_v17 = vld [vmem:[%s888_s2] sm:$0xff]   ;;  %v161_v23 = vld [vmem:[%s890_s5 + $0x8] sm:$0xff]  ;;  %v163_v27 = vld [vmem:[%s890_s5 + $0x18] sm:$0xff] }
   0x6   :  { %670 = vmatpush3.bf16.msra.mxu1 %v201_v11  ;;  %671 = vmatprep.mubr.msk.bf16.mxu1 %vm73_vm1, %v713_v12  ;;  %v717_v18 = vld [vmem:[%s889_s4] sm:$0xff]   ;;  %v40_v24 = vld [vmem:[%s891_s3 + $0x8] sm:$0xff]  ;;  %v162_v28 = vld [vmem:[%s890_s5 + $0x10] sm:$0xff] }
   0x7   :  { %705 = vmatprep.subr.msk.bf16.mxu0 %vm80_vm0, %v274_v5  ;;  %706 = vmatprep.subr.msk.bf16.mxu1 %vm80_vm0, %v394_v8  ;;  %v160_v19 = vld [vmem:[%s890_s5] sm:$0xff] }
   0x8   :  { %666 = vmatmul.mubr.msk.bf16.vlgmr.msra.gmra.mrb[0].mxu0 %vm73_vm1, %v714_v13  ;;  %v39_v20 = vld [vmem:[%s891_s3] sm:$0xff]  ;;  %166 = vperm.xlu1 %711, %v160_v19  }
   0x9   :  { %672 = vmatmul.mubr.msk.bf16.vlgmr.msra.gmra.mrb[0].mxu1 %vm73_vm1, %v715_v14  ;;  %676 = vmatpush3.bf16.msra.mxu0 %v320_v15 }
   0xa   :  { %682 = vmatpush3.bf16.msra.mxu1 %v440_v16  ;;  %677 = vmatprep.mubr.msk.bf16.mxu0 %vm73_vm1, %v716_v17 }
   0xb   :  { %683 = vmatprep.mubr.msk.bf16.mxu1 %vm73_vm1, %v717_v18  ;;  %45 = vperm.xlu0 %710, %v39_v20  }
   0xc   :  { %171 = vperm.xlu1 %711, %v161_v23  }
   0xf   :  { %50 = vperm.xlu0 %710, %v40_v24  }
  0x10   :  { %678 = vmatmul.mubr.msk.bf16.vlgmr.msra.gmra.mrb[4].mxu0 %vm73_vm1, %v718_v21  ;;  %290 = vperm.xlu1 %711, %v40_v24  }
  0x11   :  { %684 = vmatmul.mubr.msk.bf16.vlgmr.msra.gmra.mrb[4].mxu1 %vm73_vm1, %v719_v22 }
  0x13   :  { %285 = vperm.xlu0 %710, %v39_v20  }
  0x14   :  { %410 = vperm.xlu1 %711, %v161_v23  }
  0x17   :  { %405 = vperm.xlu0 %710, %v160_v19  }
  0x18   :  { %60 = vperm.xlu1 %711, %v42_v25  }
  0x1b   :  { %55 = vperm.xlu0 %710, %v41_v26  }
  0x1c   :  { %181 = vperm.xlu1 %711, %v163_v27  }
  0x1f   :  { %176 = vperm.xlu0 %710, %v162_v28  }
  0x20   :  { %300 = vperm.xlu1 %711, %v42_v25  }
  0x23   :  { %295 = vperm.xlu0 %710, %v41_v26  }
  0x24   :  { %420 = vperm.xlu1 %711, %v163_v27  }
  0x27   :  { %415 = vperm.xlu0 %710, %v162_v28  }
  0x87   :  { %v167_v30 = vpop.permute.xlu1 %166 }
  0x8a   :  { %v46_v29 = vpop.permute.xlu0 %45 }
  0x8b   :  { %v172_v32 = vpop.permute.xlu1 %171 }
  0x8e   :  { %v51_v31 = vpop.permute.xlu0 %50 }
  0x8f   :  { %v291_v34 = vpop.permute.xlu1 %290 }
  0x92   :  { %v286_v33 = vpop.permute.xlu0 %285 }
  0x93   :  { %v849_v36 = vpop.permute.xlu1 %410 }
  0x96   :  { %v406_v35 = vpop.permute.xlu0 %405 }
  0x97   :  { %v61_v38 = vpop.permute.xlu1 %60 }
  0x9a   :  { %v56_v37 = vpop.permute.xlu0 %55 }
  0x9b   :  { %v182_v54 = vpop.permute.xlu1 %181 }
  0x9e   :  { %v177_v39 = vpop.permute.xlu0 %176 }
  0x9f   :  { %v301_v12 = vpop.permute.xlu1 %300 }
  0xa2   :  { %v296_v55 = vpop.permute.xlu0 %295 }
  0xa3   :  { %v421_v25 = vpop.permute.xlu1 %420 }
  0xa6   :  { %v416_v17 = vpop.permute.xlu0 %415 }
  0xdb   :  { %v667_v40 = vpop.f32.mrb[0].mxu0 }
  0xdc   :  { %v673_v41 = vpop.f32.mrb[0].mxu1  ;;  %v127_v42 = vadd.f32 %v667_v40, %v56_v37  ;;  %v118_v43 = vpop.f32.mrb[1].mxu0 }
  0xdd   :  { %v237_v44 = vpop.f32.mrb[1].mxu1  ;;  %v119_v45 = vadd.f32 %v118_v43, %v46_v29  ;;  %v668_v46 = vpop.f32.mrb[2].mxu0  ;;  %v246_v49 = vadd.f32 %v673_v41, %v177_v39  ;;  %v612_v29 = vld [vmem:[%s892_s8] sm:$0xff] }
  0xde   :  { %v674_v47 = vpop.f32.mrb[2].mxu1  ;;  %v135_v48 = vmax.f32 %v127_v42, 0.0  ;;  %v121_v50 = vpop.f32.mrb[3].mxu0  ;;  %v238_v53 = vadd.f32 %v237_v44, %v167_v30  ;;  %v130_v59 = vadd.f32 %v668_v46, %v61_v38  ;;  %v721_v30 = vmov 0.0  }
  0xdf   :  { %v240_v51 = vpop.f32.mrb[3].mxu1  ;;  %v133_v52 = vmax.f32 %v119_v45, 0.0  ;;  %v254_v56 = vmax.f32 %v246_v49, 0.0  ;;  %v122_v57 = vadd.f32 %v121_v50, %v51_v31  ;;  %v249_v7 = vadd.f32 %v674_v47, %v182_v54  ;;  %695 = vmatprep.subr.bf16.mxu1 %v721_v30  ;;  %687 = vmatprep.subr.bf16.mxu0 %v721_v30 }
  0xe0   :  { %141 = vadd.xlane.f32.xlu1 %v135_v48  ;;  %v252_v58 = vmax.f32 %v238_v53, 0.0  ;;  %v136_v6 = vmax.f32 %v130_v59, 0.0  ;;  %v241_v11 = vadd.f32 %v240_v51, %v172_v32  ;;  %699 = vmatprep.mubr.msk.bf16.mxu1 %vm722_vm2, %v721_v30 }
  0xe1   :  { %137 = vadd.xlane.f32.xlu0 %v133_v52  ;;  %v134_v2 = vmax.f32 %v122_v57, 0.0  ;;  %v255_v10 = vmax.f32 %v249_v7, 0.0  ;;  %691 = vmatprep.mubr.msk.bf16.mxu0 %vm722_vm2, %v721_v30 }
  0xe2   :  { %v253_v15 = vmax.f32 %v241_v11, 0.0 }
  0xe3   :  { %v679_v60 = vpop.f32.mrb[4].mxu0 }
  0xe4   :  { %v685_v61 = vpop.f32.mrb[4].mxu1  ;;  %260 = vadd.xlane.f32.xlu1 %v254_v56  ;;  %v356_v63 = vpop.f32.mrb[5].mxu0  ;;  %v365_v3 = vadd.f32 %v679_v60, %v296_v55 }
  0xe5   :  { %v476_v62 = vpop.f32.mrb[5].mxu1  ;;  %v680_v0 = vpop.f32.mrb[6].mxu0  ;;  %256 = vadd.xlane.f32.xlu0 %v252_v58  ;;  %v357_v9 = vadd.f32 %v356_v63, %v286_v33  ;;  %v485_v18 = vadd.f32 %v685_v61, %v416_v17 }
  0xe6   :  { %v686_v1 = vpop.f32.mrb[6].mxu1  ;;  %v359_v4 = vpop.f32.mrb[7].mxu0  ;;  %v373_v8 = vmax.f32 %v365_v3, 0.0  ;;  %v477_v13 = vadd.f32 %v476_v62, %v406_v35  ;;  %v368_v16 = vadd.f32 %v680_v0, %v301_v12  ;;  %v518_v12 = vld [vmem:[%s894_s7] sm:$0xf] }
  0xe7   :  { %v479_v5 = vpop.f32.mrb[7].mxu1  ;;  %v371_v14 = vmax.f32 %v357_v9, 0.0  ;;  %v360_v21 = vadd.f32 %v359_v4, %v291_v34  ;;  %v493_v22 = vmax.f32 %v485_v18, 0.0  ;;  %v488_v26 = vadd.f32 %v686_v1, %v421_v25 }
  0xe8   :  { %139 = vadd.xlane.f32.xlu1 %v134_v2  ;;  %v491_v19 = vmax.f32 %v477_v13, 0.0  ;;  %v374_v20 = vmax.f32 %v368_v16, 0.0  ;;  %v480_v24 = vadd.f32 %v479_v5, %v849_v36 }
  0xe9   :  { %143 = vadd.xlane.f32.xlu0 %v136_v6  ;;  %v372_v23 = vmax.f32 %v360_v21, 0.0  ;;  %v494_v28 = vmax.f32 %v488_v26, 0.0 }
  0xea   :  { %v492_v27 = vmax.f32 %v480_v24, 0.0 }
  0xec   :  { %379 = vadd.xlane.f32.xlu1 %v373_v8  ;;  %v511_v8 = vld [vmem:[%s893_s6] sm:$0xf] }
  0xed   :  { %262 = vadd.xlane.f32.xlu0 %v255_v10 }
  0xf0   :  { %375 = vadd.xlane.f32.xlu1 %v371_v14 }
  0xf1   :  { %258 = vadd.xlane.f32.xlu0 %v253_v15 }
  0xf4   :  { %495 = vadd.xlane.f32.xlu1 %v491_v19 }
  0xf5   :  { %381 = vadd.xlane.f32.xlu0 %v374_v20 }
  0xf8   :  { %499 = vadd.xlane.f32.xlu1 %v493_v22 }
  0xf9   :  { %377 = vadd.xlane.f32.xlu0 %v372_v23 }
  0xfd   :  { %497 = vadd.xlane.f32.xlu0 %v492_v27 }
 0x101   :  { %501 = vadd.xlane.f32.xlu0 %v494_v28 }
 0x109   :  { %615 = vperm.xlu1 %711, %v612_v29  }
 0x16d   :  { %v142_v31 = vpop.xlane.xlu1 %141 }
 0x16e   :  { %v147_v32 = vmul.f32 0.0078125, %v142_v31  ;;  %v138_v33 = vpop.xlane.xlu0 %137 }
 0x16f   :  { %v145_v34 = vmul.f32 0.0078125, %v138_v33 }
 0x170   :  { %152 = vst.msk [vmem:[#allocation2 + $0x10] sm:$0xff] %vm149_vm3, %v147_v32 }
 0x171   :  { %150 = vst.msk [vmem:[#allocation2] sm:$0xff] %vm149_vm3, %v145_v34  ;;  %v261_v35 = vpop.xlane.xlu1 %260 }
 0x172   :  { %v266_v36 = vmul.f32 0.0078125, %v261_v35  ;;  %v257_v37 = vpop.xlane.xlu0 %256 }
 0x173   :  { %v264_v38 = vmul.f32 0.0078125, %v257_v37 }
 0x174   :  { %270 = vst.msk [vmem:[#allocation3 + $0x10] sm:$0xff] %vm149_vm3, %v266_v36 }
 0x175   :  { %268 = vst.msk [vmem:[#allocation3] sm:$0xff] %vm149_vm3, %v264_v38  ;;  %v140_v39 = vpop.xlane.xlu1 %139 }
 0x176   :  { %v146_v40 = vmul.f32 0.0078125, %v140_v39  ;;  %v144_v41 = vpop.xlane.xlu0 %143 }
 0x177   :  { %v148_v42 = vmul.f32 0.0078125, %v144_v41 }
 0x178   :  { %151 = vst.msk [vmem:[#allocation2 + $0x8] sm:$0xff] %vm149_vm3, %v146_v40 }
 0x179   :  { %153 = vst.msk [vmem:[#allocation2 + $0x18] sm:$0xff] %vm149_vm3, %v148_v42  ;;  %v380_v43 = vpop.xlane.xlu1 %379 }
 0x17a   :  { %v385_v44 = vmul.f32 0.0078125, %v380_v43  ;;  %v263_v45 = vpop.xlane.xlu0 %262 }
 0x17b   :  { %v267_v46 = vmul.f32 0.0078125, %v263_v45 }
 0x17c   :  { %390 = vst.msk [vmem:[#allocation2 + $0x10] sm:$0xff] %vm387_vm4, %v385_v44 }
 0x17d   :  { %271 = vst.msk [vmem:[#allocation3 + $0x18] sm:$0xff] %vm149_vm3, %v267_v46  ;;  %v376_v47 = vpop.xlane.xlu1 %375 }
 0x17e   :  { %v383_v48 = vmul.f32 0.0078125, %v376_v47  ;;  %v259_v49 = vpop.xlane.xlu0 %258 }
 0x17f   :  { %v265_v50 = vmul.f32 0.0078125, %v259_v49 }
 0x180   :  { %388 = vst.msk [vmem:[#allocation2] sm:$0xff] %vm387_vm4, %v383_v48 }
 0x181   :  { %269 = vst.msk [vmem:[#allocation3 + $0x8] sm:$0xff] %vm149_vm3, %v265_v50  ;;  %v496_v51 = vpop.xlane.xlu1 %495 }
 0x182   :  { %v503_v52 = vmul.f32 0.0078125, %v496_v51  ;;  %v382_v53 = vpop.xlane.xlu0 %381 }
 0x183   :  { %v386_v54 = vmul.f32 0.0078125, %v382_v53  ;;  %v514_v5 = vld [vmem:[#allocation2 + $0x10] sm:$0xff] }
 0x184   :  { %507 = vst.msk [vmem:[#allocation3] sm:$0xff] %vm387_vm4, %v503_v52 }
 0x185   :  { %391 = vst.msk [vmem:[#allocation2 + $0x18] sm:$0xff] %vm387_vm4, %v386_v54  ;;  %v500_v55 = vpop.xlane.xlu1 %499 }
 0x186   :  { %v505_v56 = vmul.f32 0.0078125, %v500_v55  ;;  %v378_v57 = vpop.xlane.xlu0 %377 }
 0x187   :  { %v384_v58 = vmul.f32 0.0078125, %v378_v57  ;;  %v512_v63 = vld [vmem:[#allocation2] sm:$0xff] }
 0x188   :  { %509 = vst.msk [vmem:[#allocation3 + $0x10] sm:$0xff] %vm387_vm4, %v505_v56 }
 0x189   :  { %389 = vst.msk [vmem:[#allocation2 + $0x8] sm:$0xff] %vm387_vm4, %v384_v58  ;;  %v616_v20 = vpop.permute.xlu1 %615 }
 0x18a   :  { %v498_v59 = vpop.xlane.xlu0 %497 }
 0x18b   :  { %v504_v60 = vmul.f32 0.0078125, %v498_v59  ;;  %v519_v3 = vld [vmem:[#allocation3] sm:$0xff] }
 0x18c   :  { %v515_v2 = vld [vmem:[#allocation2 + $0x18] sm:$0xff] }
 0x18d   :  { %508 = vst.msk [vmem:[#allocation3 + $0x8] sm:$0xff] %vm387_vm4, %v504_v60  ;;  %v517_v7 = vpack.c.bf16 %v515_v2, %v514_v5 }
 0x18e   :  { %v502_v61 = vpop.xlane.xlu0 %501 }
 0x18f   :  { %v506_v62 = vmul.f32 0.0078125, %v502_v61  ;;  %v521_v9 = vld [vmem:[#allocation3 + $0x10] sm:$0xff] }
 0x190   :  { %v513_v0 = vld [vmem:[#allocation2 + $0x8] sm:$0xff] }
 0x191   :  { %510 = vst.msk [vmem:[#allocation3 + $0x18] sm:$0xff] %vm387_vm4, %v506_v62  ;;  %v516_v1 = vpack.c.bf16 %v513_v0, %v512_v63 }
 0x193   :  { %696 = vmatpush3.bf16.msra.mxu1 %v516_v1 }
 0x194   :  { %697 = vmatprep.subr.bf16.mxu1 %v721_v30  ;;  %v520_v4 = vld [vmem:[#allocation3 + $0x8] sm:$0xff] }
 0x195   :  { %v523_v6 = vpack.c.bf16 %v520_v4, %v519_v3 }
 0x197   :  { %688 = vmatpush3.bf16.msra.mxu0 %v523_v6  ;;  %698 = vmatpush3.bf16.msra.mxu1 %v517_v7 }
 0x198   :  { %689 = vmatprep.subr.bf16.mxu0 %v721_v30  ;;  %v522_v10 = vld [vmem:[#allocation3 + $0x18] sm:$0xff] }
 0x199   :  { %v524_v11 = vpack.c.bf16 %v522_v10, %v521_v9 }
 0x19a   :  { %700 = vmatmul.mubr.msk.bf16.vlgmr.msra.gmra.mrb[8].mxu1 %vm525_vm5, %v511_v8 }
 0x19b   :  { %690 = vmatpush3.bf16.msra.mxu0 %v524_v11 }
 0x19e   :  { %692 = vmatmul.mubr.msk.bf16.vlgmr.msra.gmra.mrb[8].mxu0 %vm525_vm5, %v518_v12 }
 0x26d   :  { %v606_v13 = vpop.f32.mrb[8].mxu1 }
 0x26e   :  { %v701_v14 = vpop.f32.mrb[9].mxu1 }
 0x26f   :  { %v609_v15 = vpop.f32.mrb[10].mxu1 }
 0x270   :  { %v702_v16 = vpop.f32.mrb[11].mxu1 }
 0x271   :  { %v563_v17 = vpop.f32.mrb[8].mxu0 }
 0x272   :  { %v607_v18 = vadd.f32 %v606_v13, %v563_v17  ;;  %v693_v19 = vpop.f32.mrb[9].mxu0 }
 0x273   :  { %v566_v21 = vpop.f32.mrb[10].mxu0 }
 0x274   :  { %v618_v22 = vadd.f32 %v616_v20, %v607_v18  ;;  %v694_v23 = vpop.f32.mrb[11].mxu0 }
 0x276   :  { %620 = vst.msk [vmem:[%s895_s9] sm:$0xff] %vm619_vm6, %v618_v22 }

</bundles_post_ra>
